<compile_context>
chip_gen: v5e
topology: v5e:2x2
jax: 0.10.0
libtpu: 0.0.40
codegen_flags: <defaults>
</compile_context>

<pallas_src>
import functools

import jax
import jax.numpy as jnp
from jax import lax
from jax.experimental import pallas as pl
from jax.experimental.pallas import tpu as pltpu


def _softmaxproto_kernel(x_ref, W_ref, fcb_ref, labels_ref, w_ref, b_ref,
                         loss_ref, prec_ref,
                         m_run, s_run, t_run,
                         *, num_classes, batch):
    # x_ref:      (N=2B, D) resident, utterance-major (pos rows then anchor rows)
    # W_ref:      (Ct, D) class tile of the fc weight
    # fcb_ref:    (1, Ct) fc bias tile (f32)
    # labels_ref: (N, 1) int32 resident
    # w_ref/b_ref: (1, 1) f32 AngleProto scalars in SMEM
    c = pl.program_id(0)
    last = pl.num_programs(0) - 1

    @pl.when(c == 0)
    def _init():
        m_run[...] = jnp.full(m_run.shape, -jnp.inf, dtype=jnp.float32)
        s_run[...] = jnp.zeros(s_run.shape, dtype=jnp.float32)
        t_run[...] = jnp.zeros(t_run.shape, dtype=jnp.float32)

    x = x_ref[...]                         # (N, D) native dtype (f32 or bf16)
    W = W_ref[...]                         # (Ct, D)
    labels = labels_ref[...]               # (N, 1) int32

    # ---------------- SoftmaxLoss branch: logits tile = x @ W_tile^T + b ----
    logits = lax.dot_general(x, W, (((1,), (1,)), ((), ())),
                             preferred_element_type=jnp.float32)
    logits = logits + fcb_ref[...].astype(jnp.float32)           # (N, Ct)

    n, ct = logits.shape
    gcol = c * ct + lax.broadcasted_iota(jnp.int32, (n, ct), 1)
    logits = jnp.where(gcol < num_classes, logits, -jnp.inf)     # mask pad cols

    # fused one-hot: each label lands in exactly one class tile
    t_run[...] += jnp.sum(jnp.where(gcol == labels, logits, 0.0),
                          axis=-1, keepdims=True)

    # online logsumexp accumulators
    m_new = jnp.maximum(m_run[...], jnp.max(logits, axis=-1, keepdims=True))
    s_run[...] = (s_run[...] * jnp.exp(m_run[...] - m_new)
                  + jnp.sum(jnp.exp(logits - m_new), axis=-1, keepdims=True))
    m_run[...] = m_new

    @pl.when(c == last)
    def _finalize():
        lse = m_run[...] + jnp.log(s_run[...])                    # (N, 1)
        nlossS = jnp.sum(lse - t_run[...], axis=0, keepdims=True) * (1.0 / n)
        # top-1 precision (%); tie-free equivalent of topk(1) == label
        correct = (t_run[...] >= m_run[...]).astype(jnp.float32)
        prec_ref[...] = jnp.sum(correct, axis=0, keepdims=True) * (100.0 / n)

        # ---------------- AngleProto branch (B x B), computed once ----------
        pos = x[:batch, :]                                        # out_positive
        anc = x[batch:, :]                                        # mean(x[:,1:,:]) for nPerSpeaker==2
        dots = lax.dot_general(pos, anc, (((1,), (1,)), ((), ())),
                               preferred_element_type=jnp.float32)   # (B, B)
        pos_f = pos.astype(jnp.float32)
        anc_f = anc.astype(jnp.float32)
        inv_pn = lax.rsqrt(jnp.maximum(
            jnp.sum(pos_f * pos_f, axis=-1, keepdims=True), 1e-12))  # EUP
        inv_an = lax.rsqrt(jnp.maximum(
            jnp.sum(anc_f * anc_f, axis=-1, keepdims=True), 1e-12))
        inv_outer = lax.dot_general(inv_pn, inv_an, (((1,), (1,)), ((), ())),
                                    preferred_element_type=jnp.float32)
        scaled = dots * inv_outer * w_ref[0, 0] + b_ref[0, 0]
        # (torch.clamp(self.w, 1e-6) result is discarded in the reference — raw w used.)

        ri = lax.broadcasted_iota(jnp.int32, (batch, batch), 0)
        ci = lax.broadcasted_iota(jnp.int32, (batch, batch), 1)
        rmax = jnp.max(scaled, axis=-1, keepdims=True)
        lse2 = jnp.log(jnp.sum(jnp.exp(scaled - rmax), axis=-1,
                               keepdims=True)) + rmax
        tgt2 = jnp.sum(jnp.where(ri == ci, scaled, 0.0), axis=-1, keepdims=True)
        nlossP = jnp.sum(lse2 - tgt2, axis=0, keepdims=True) * (1.0 / batch)

        loss_ref[...] = nlossS + nlossP


@functools.partial(jax.jit, static_argnames=("class_tile",))
def softmaxproto_loss(x, labels_rep, W, fc_bias, ap_w, ap_b, *, class_tile=512):
    """x: (B, 2, D); labels_rep: (2B,) int (interleaved like x.reshape(-1, D));
    W: (C, D) nn.Linear weight; fc_bias: (C,); ap_w/ap_b: AngleProto scalars."""
    B, P, D = x.shape
    assert P == 2, "SoftmaxprotoLoss requires nPerSpeaker == 2"
    C = W.shape[0]
    N = B * P

    # Ship the embeddings ONCE, utterance-major so pos/anc are contiguous slices.
    x_um = jnp.transpose(x, (1, 0, 2)).reshape(N, D)
    # Reorder labels identically (CE / precision means are row-order invariant).
    lab_um = jnp.transpose(labels_rep.astype(jnp.int32).reshape(B, P)).reshape(N, 1)

    fcb2 = fc_bias.reshape(1, C).astype(jnp.float32)
    w2 = jnp.asarray(ap_w, jnp.float32).reshape(1, 1)
    b2 = jnp.asarray(ap_b, jnp.float32).reshape(1, 1)

    # Class tile: full C when small, else a lane-aligned multiple of 128.
    ct = C if C <= class_tile else (class_tile // 128) * 128
    num_ct = pl.cdiv(C, ct)

    # VMEM budget: resident x + double-buffered W/bias stream + (N, Ct) logits
    # temporaries + lane-padded accumulators, with headroom.
    est = (N * D * x.dtype.itemsize
           + 2 * ct * D * W.dtype.itemsize
           + 2 * max(ct, 128) * 4
           + 4 * N * max(ct, 128) * 4
           + 3 * N * 128 * 4)
    vmem_limit = int(min(max(2 * est + (8 << 20), 32 << 20), 112 << 20))

    cost = pl.CostEstimate(
        flops=2 * N * D * C + 2 * B * B * D,
        transcendentals=N * C + B * B,
        bytes_accessed=(C * D * W.dtype.itemsize + N * D * x.dtype.itemsize
                        + C * 4 + N * 4 + 16))

    kernel = functools.partial(_softmaxproto_kernel, num_classes=C, batch=B)

    loss, prec = pl.pallas_call(
        kernel,
        out_shape=(jax.ShapeDtypeStruct((1, 1), jnp.float32),
                   jax.ShapeDtypeStruct((1, 1), jnp.float32)),
        grid_spec=pltpu.PrefetchScalarGridSpec(
            num_scalar_prefetch=0,
            grid=(num_ct,),
            in_specs=[
                pl.BlockSpec((N, D), lambda c: (0, 0)),            # x (resident)
                pl.BlockSpec((ct, D), lambda c: (c, 0)),           # W class tile
                pl.BlockSpec((1, ct), lambda c: (0, c)),           # fc bias tile
                pl.BlockSpec((N, 1), lambda c: (0, 0)),            # labels (resident)
                pl.BlockSpec(memory_space=pltpu.MemorySpace.SMEM),  # angleproto w
                pl.BlockSpec(memory_space=pltpu.MemorySpace.SMEM),  # angleproto b
            ],
            out_specs=(pl.BlockSpec((1, 1), lambda c: (0, 0)),
                       pl.BlockSpec((1, 1), lambda c: (0, 0))),
            scratch_shapes=[pltpu.VMEM((N, 1), jnp.float32),   # running max
                            pltpu.VMEM((N, 1), jnp.float32),   # running sum-exp
                            pltpu.VMEM((N, 1), jnp.float32)]), # target logit
        compiler_params=pltpu.CompilerParams(
            dimension_semantics=("arbitrary",),
            vmem_limit_bytes=vmem_limit),
        cost_estimate=cost,
    )(x_um, W, fcb2, lab_um, w2, b2)
    return loss[0, 0], prec[0, 0]


def _reference(x, labels_rep, W, fc_bias, w, b):
    """Pure-jnp reference of the intended forward pass."""
    x_flat = x.reshape(-1, x.shape[-1])
    logits = x_flat @ W.T + fc_bias
    lse = jax.nn.logsumexp(logits, axis=-1)
    tgt = logits[jnp.arange(logits.shape[0]), labels_rep]
    nlossS = jnp.mean(lse - tgt)
    pred = jnp.argmax(logits, axis=-1)
    prec = jnp.mean((pred == labels_rep).astype(jnp.float32)) * 100.0

    pos, anc = x[:, 0, :], x[:, 1, :]
    dots = pos @ anc.T
    denom = jnp.maximum(jnp.linalg.norm(pos, axis=-1, keepdims=True)
                        * jnp.linalg.norm(anc, axis=-1)[None, :], 1e-8)
    cos = dots / denom * w + b
    lse2 = jax.nn.logsumexp(cos, axis=-1)
    nlossP = jnp.mean(lse2 - jnp.diagonal(cos))
    return nlossS + nlossP, prec


if __name__ == "__main__":
    B, nPerSpeaker, D, C = 8, 2, 32, 16   # in_features=32, out_features=16

    key = jax.random.PRNGKey(0)
    kx, kl, kw, kb = jax.random.split(key, 4)

    # module input: (B, nPerSpeaker, D); reshape(-1, 2, D) in the module is a no-op
    x = jax.random.normal(kx, (B, nPerSpeaker, D), dtype=jnp.float32)

    # per-speaker class labels, repeated per utterance for the softmax branch
    labels = jax.random.randint(kl, (B,), 0, C, dtype=jnp.int32)
    labels_rep = jnp.repeat(labels, nPerSpeaker)

    # deterministic "parameters": nn.Linear(in_features, out_features) + AngleProto w/b
    W = jax.random.normal(kw, (C, D), dtype=jnp.float32) * (1.0 / jnp.sqrt(D))
    fc_bias = jax.random.normal(kb, (C,), dtype=jnp.float32) * 0.01
    ap_w, ap_b = 10.0, -5.0

    loss, prec1 = softmaxproto_loss(x, labels_rep, W, fc_bias, ap_w, ap_b)
    jax.block_until_ready((loss, prec1))

    ref_loss, ref_prec = _reference(x, labels_rep, W, fc_bias, ap_w, ap_b)
    assert jnp.allclose(loss, ref_loss, rtol=1e-3, atol=1e-3), (loss, ref_loss)
    assert jnp.allclose(prec1, ref_prec, rtol=1e-3, atol=1e-3), (prec1, ref_prec)

    print("KERNEL_OK")
</pallas_src>

<mosaic_0001>
module attributes {stable_mosaic.version = 11 : i64} {
  func.func @_softmaxproto_kernel(%arg0: i32, %arg1: memref<16x32xf32, #tpu.memory_space<vmem>>, %arg2: memref<16x32xf32, #tpu.memory_space<vmem>>, %arg3: memref<1x16xf32, #tpu.memory_space<vmem>>, %arg4: memref<16x1xi32, #tpu.memory_space<vmem>>, %arg5: memref<1x1xf32, #tpu.memory_space<smem>>, %arg6: memref<1x1xf32, #tpu.memory_space<smem>>, %arg7: memref<1x1xf32, #tpu.memory_space<vmem>>, %arg8: memref<1x1xf32, #tpu.memory_space<vmem>>, %arg9: memref<16x1xf32, #tpu.memory_space<vmem>>, %arg10: memref<16x1xf32, #tpu.memory_space<vmem>>, %arg11: memref<16x1xf32, #tpu.memory_space<vmem>>) attributes {dimension_semantics = [#tpu.dimension_semantics<arbitrary>], iteration_bounds = array<i64: 1>, scalar_prefetch = 0 : i64, scratch_operands = 3 : i64, tpu.core_type = #tpu.core_type<tc>, window_params = [{pipeline_mode = #tpu.pipeline_mode<synchronous>, transform_indices = @transform_0, window_bounds = array<i64: 16, 32>}, {transform_indices = @transform_1, window_bounds = array<i64: 16, 32>}, {transform_indices = @transform_2, window_bounds = array<i64: 1, 16>}, {pipeline_mode = #tpu.pipeline_mode<synchronous>, transform_indices = @transform_3, window_bounds = array<i64: 16, 1>}, {transform_indices = @transform_4, window_bounds = array<i64: 1, 1>}, {transform_indices = @transform_5, window_bounds = array<i64: 1, 1>}, {pipeline_mode = #tpu.pipeline_mode<synchronous>, transform_indices = @transform_6, window_bounds = array<i64: 1, 1>}, {pipeline_mode = #tpu.pipeline_mode<synchronous>, transform_indices = @transform_7, window_bounds = array<i64: 1, 1>}]} {
    %c0_i32 = arith.constant 0 : i32
    %0 = arith.cmpi eq, %arg0, %c0_i32 : i32
    %1 = arith.extui %0 : i1 to i32
    %c0_i32_0 = arith.constant 0 : i32
    %2 = arith.cmpi ne, %1, %c0_i32_0 : i32
    scf.if %2 {
      %cst_30 = arith.constant 0xFF800000 : f32
      %47 = vector.broadcast %cst_30 : f32 to vector<16x1xf32>
      %c0_31 = arith.constant 0 : index
      %c0_32 = arith.constant 0 : index
      %48 = vector.load %arg9[%c0_31, %c0_32] : memref<16x1xf32, #tpu.memory_space<vmem>>, vector<16x1xf32>
      tpu.vector_store %arg9[%c0_31, %c0_32], %47 {strides = array<i32>} : memref<16x1xf32, #tpu.memory_space<vmem>>, vector<16x1xf32>,
      %cst_33 = arith.constant 0.000000e+00 : f32
      %49 = vector.broadcast %cst_33 : f32 to vector<16x1xf32>
      %c0_34 = arith.constant 0 : index
      %c0_35 = arith.constant 0 : index
      %50 = vector.load %arg10[%c0_34, %c0_35] : memref<16x1xf32, #tpu.memory_space<vmem>>, vector<16x1xf32>
      tpu.vector_store %arg10[%c0_34, %c0_35], %49 {strides = array<i32>} : memref<16x1xf32, #tpu.memory_space<vmem>>, vector<16x1xf32>,
      %cst_36 = arith.constant 0.000000e+00 : f32
      %51 = vector.broadcast %cst_36 : f32 to vector<16x1xf32>
      %c0_37 = arith.constant 0 : index
      %c0_38 = arith.constant 0 : index
      %52 = vector.load %arg11[%c0_37, %c0_38] : memref<16x1xf32, #tpu.memory_space<vmem>>, vector<16x1xf32>
      tpu.vector_store %arg11[%c0_37, %c0_38], %51 {strides = array<i32>} : memref<16x1xf32, #tpu.memory_space<vmem>>, vector<16x1xf32>,
    } else {
    }
    %c0 = arith.constant 0 : index
    %c0_1 = arith.constant 0 : index
    %3 = vector.load %arg1[%c0, %c0_1] : memref<16x32xf32, #tpu.memory_space<vmem>>, vector<16x32xf32>
    %c0_2 = arith.constant 0 : index
    %c0_3 = arith.constant 0 : index
    %4 = vector.load %arg2[%c0_2, %c0_3] : memref<16x32xf32, #tpu.memory_space<vmem>>, vector<16x32xf32>
    %c0_4 = arith.constant 0 : index
    %c0_5 = arith.constant 0 : index
    %5 = vector.load %arg4[%c0_4, %c0_5] : memref<16x1xi32, #tpu.memory_space<vmem>>, vector<16x1xi32>
    %cst = arith.constant dense<0.000000e+00> : vector<16x16xf32>
    %6 = tpu.matmul %3, %4, %cst {dimension_numbers = #tpu.dot_dimension_numbers<[1], [1], [0], [0], [0, 0, 1, 0], [], []>} : vector<16x32xf32>, vector<16x32xf32>, vector<16x16xf32> -> vector<16x16xf32>
    %c0_6 = arith.constant 0 : index
    %c0_7 = arith.constant 0 : index
    %7 = vector.load %arg3[%c0_6, %c0_7] : memref<1x16xf32, #tpu.memory_space<vmem>>, vector<1x16xf32>
    %8 = vector.broadcast %7 : vector<1x16xf32> to vector<16x16xf32>
    %9 = arith.addf %6, %8 : vector<16x16xf32>
    %c16_i32 = arith.constant 16 : i32
    %10 = arith.muli %arg0, %c16_i32 : i32
    %11 = tpu.iota {dimensions = array<i32: 1>} : vector<16x16xi32>
    %12 = vector.broadcast %10 : i32 to vector<16x16xi32>
    %13 = arith.addi %12, %11 : vector<16x16xi32>
    %c16_i32_8 = arith.constant 16 : i32
    %14 = vector.broadcast %c16_i32_8 : i32 to vector<16x16xi32>
    %15 = arith.cmpi slt, %13, %14 : vector<16x16xi32>
    %cst_9 = arith.constant 0xFF800000 : f32
    %16 = vector.broadcast %cst_9 : f32 to vector<16x16xf32>
    %17 = arith.select %15, %9, %16 : vector<16x16xi1>, vector<16x16xf32>
    %c0_10 = arith.constant 0 : index
    %c0_11 = arith.constant 0 : index
    %18 = vector.load %arg11[%c0_10, %c0_11] : memref<16x1xf32, #tpu.memory_space<vmem>>, vector<16x1xf32>
    %19 = vector.broadcast %5 : vector<16x1xi32> to vector<16x16xi32>
    %20 = arith.cmpi eq, %13, %19 : vector<16x16xi32>
    %cst_12 = arith.constant 0.000000e+00 : f32
    %21 = vector.broadcast %cst_12 : f32 to vector<16x16xf32>
    %22 = arith.select %20, %17, %21 : vector<16x16xi1>, vector<16x16xf32>
    %cst_13 = arith.constant dense<0.000000e+00> : vector<16xf32>
    %23 = vector.multi_reduction <add>, %22, %cst_13 [1] : vector<16x16xf32> to vector<16xf32>
    %24 = vector.shape_cast %23 : vector<16xf32> to vector<16x1xf32>
    %25 = arith.addf %18, %24 : vector<16x1xf32>
    %c0_14 = arith.constant 0 : index
    %c0_15 = arith.constant 0 : index
    %26 = vector.load %arg11[%c0_14, %c0_15] : memref<16x1xf32, #tpu.memory_space<vmem>>, vector<16x1xf32>
    tpu.vector_store %arg11[%c0_14, %c0_15], %25 {strides = array<i32>} : memref<16x1xf32, #tpu.memory_space<vmem>>, vector<16x1xf32>,
    %c0_16 = arith.constant 0 : index
    %c0_17 = arith.constant 0 : index
    %27 = vector.load %arg9[%c0_16, %c0_17] : memref<16x1xf32, #tpu.memory_space<vmem>>, vector<16x1xf32>
    %cst_18 = arith.constant dense<0xFF800000> : vector<16xf32>
    %28 = vector.multi_reduction <maximumf>, %17, %cst_18 [1] : vector<16x16xf32> to vector<16xf32>
    %29 = vector.shape_cast %28 : vector<16xf32> to vector<16x1xf32>
    %30 = arith.maximumf %27, %29 : vector<16x1xf32>
    %c0_19 = arith.constant 0 : index
    %c0_20 = arith.constant 0 : index
    %31 = vector.load %arg10[%c0_19, %c0_20] : memref<16x1xf32, #tpu.memory_space<vmem>>, vector<16x1xf32>
    %c0_21 = arith.constant 0 : index
    %c0_22 = arith.constant 0 : index
    %32 = vector.load %arg9[%c0_21, %c0_22] : memref<16x1xf32, #tpu.memory_space<vmem>>, vector<16x1xf32>
    %33 = arith.subf %32, %30 : vector<16x1xf32>
    %34 = math.exp %33 : vector<16x1xf32>
    %35 = arith.mulf %31, %34 : vector<16x1xf32>
    %36 = vector.broadcast %30 : vector<16x1xf32> to vector<16x16xf32>
    %37 = arith.subf %17, %36 : vector<16x16xf32>
    %38 = math.exp %37 : vector<16x16xf32>
    %cst_23 = arith.constant dense<0.000000e+00> : vector<16xf32>
    %39 = vector.multi_reduction <add>, %38, %cst_23 [1] : vector<16x16xf32> to vector<16xf32>
    %40 = vector.shape_cast %39 : vector<16xf32> to vector<16x1xf32>
    %41 = arith.addf %35, %40 : vector<16x1xf32>
    %c0_24 = arith.constant 0 : index
    %c0_25 = arith.constant 0 : index
    %42 = vector.load %arg10[%c0_24, %c0_25] : memref<16x1xf32, #tpu.memory_space<vmem>>, vector<16x1xf32>
    tpu.vector_store %arg10[%c0_24, %c0_25], %41 {strides = array<i32>} : memref<16x1xf32, #tpu.memory_space<vmem>>, vector<16x1xf32>,
    %c0_26 = arith.constant 0 : index
    %c0_27 = arith.constant 0 : index
    %43 = vector.load %arg9[%c0_26, %c0_27] : memref<16x1xf32, #tpu.memory_space<vmem>>, vector<16x1xf32>
    tpu.vector_store %arg9[%c0_26, %c0_27], %30 {strides = array<i32>} : memref<16x1xf32, #tpu.memory_space<vmem>>, vector<16x1xf32>,
    %c0_i32_28 = arith.constant 0 : i32
    %44 = arith.cmpi eq, %arg0, %c0_i32_28 : i32
    %45 = arith.extui %44 : i1 to i32
    %c0_i32_29 = arith.constant 0 : i32
    %46 = arith.cmpi ne, %45, %c0_i32_29 : i32
    scf.if %46 {
      %c0_30 = arith.constant 0 : index
      %c0_31 = arith.constant 0 : index
      %47 = vector.load %arg9[%c0_30, %c0_31] : memref<16x1xf32, #tpu.memory_space<vmem>>, vector<16x1xf32>
      %c0_32 = arith.constant 0 : index
      %c0_33 = arith.constant 0 : index
      %48 = vector.load %arg10[%c0_32, %c0_33] : memref<16x1xf32, #tpu.memory_space<vmem>>, vector<16x1xf32>
      %49 = math.log %48 : vector<16x1xf32>
      %50 = arith.addf %47, %49 : vector<16x1xf32>
      %c0_34 = arith.constant 0 : index
      %c0_35 = arith.constant 0 : index
      %51 = vector.load %arg11[%c0_34, %c0_35] : memref<16x1xf32, #tpu.memory_space<vmem>>, vector<16x1xf32>
      %52 = arith.subf %50, %51 : vector<16x1xf32>
      %cst_36 = arith.constant dense<0.000000e+00> : vector<1xf32>
      %53 = vector.multi_reduction <add>, %52, %cst_36 [0] : vector<16x1xf32> to vector<1xf32>
      %54 = vector.shape_cast %53 : vector<1xf32> to vector<1x1xf32>
      %cst_37 = arith.constant 6.250000e-02 : f32
      %55 = vector.broadcast %cst_37 : f32 to vector<1x1xf32>
      %56 = arith.mulf %54, %55 : vector<1x1xf32>
      %c0_38 = arith.constant 0 : index
      %c0_39 = arith.constant 0 : index
      %57 = vector.load %arg11[%c0_38, %c0_39] : memref<16x1xf32, #tpu.memory_space<vmem>>, vector<16x1xf32>
      %c0_40 = arith.constant 0 : index
      %c0_41 = arith.constant 0 : index
      %58 = vector.load %arg9[%c0_40, %c0_41] : memref<16x1xf32, #tpu.memory_space<vmem>>, vector<16x1xf32>
      %59 = arith.cmpf oge, %57, %58 : vector<16x1xf32>
      %60 = arith.extui %59 : vector<16x1xi1> to vector<16x1xi32>
      %61 = arith.sitofp %60 : vector<16x1xi32> to vector<16x1xf32>
      %cst_42 = arith.constant dense<0.000000e+00> : vector<1xf32>
      %62 = vector.multi_reduction <add>, %61, %cst_42 [0] : vector<16x1xf32> to vector<1xf32>
      %63 = vector.shape_cast %62 : vector<1xf32> to vector<1x1xf32>
      %cst_43 = arith.constant 6.250000e+00 : f32
      %64 = vector.broadcast %cst_43 : f32 to vector<1x1xf32>
      %65 = arith.mulf %63, %64 : vector<1x1xf32>
      %c0_44 = arith.constant 0 : index
      %c0_45 = arith.constant 0 : index
      %66 = vector.load %arg8[%c0_44, %c0_45] : memref<1x1xf32, #tpu.memory_space<vmem>>, vector<1x1xf32>
      tpu.vector_store %arg8[%c0_44, %c0_45], %65 {strides = array<i32>} : memref<1x1xf32, #tpu.memory_space<vmem>>, vector<1x1xf32>,
      %67 = vector.extract_strided_slice %3 {offsets = [0, 0], sizes = [8, 32], strides = [1, 1]} : vector<16x32xf32> to vector<8x32xf32>
      %68 = vector.extract_strided_slice %3 {offsets = [8, 0], sizes = [8, 32], strides = [1, 1]} : vector<16x32xf32> to vector<8x32xf32>
      %cst_46 = arith.constant dense<0.000000e+00> : vector<8x8xf32>
      %69 = tpu.matmul %67, %68, %cst_46 {dimension_numbers = #tpu.dot_dimension_numbers<[1], [1], [0], [0], [0, 0, 1, 0], [], []>} : vector<8x32xf32>, vector<8x32xf32>, vector<8x8xf32> -> vector<8x8xf32>
      %70 = arith.mulf %67, %67 : vector<8x32xf32>
      %cst_47 = arith.constant dense<0.000000e+00> : vector<8xf32>
      %71 = vector.multi_reduction <add>, %70, %cst_47 [1] : vector<8x32xf32> to vector<8xf32>
      %72 = vector.shape_cast %71 : vector<8xf32> to vector<8x1xf32>
      %cst_48 = arith.constant 9.99999996E-13 : f32
      %73 = vector.broadcast %cst_48 : f32 to vector<8x1xf32>
      %74 = arith.maximumf %72, %73 : vector<8x1xf32>
      %75 = math.rsqrt %74 : vector<8x1xf32>
      %76 = arith.mulf %68, %68 : vector<8x32xf32>
      %cst_49 = arith.constant dense<0.000000e+00> : vector<8xf32>
      %77 = vector.multi_reduction <add>, %76, %cst_49 [1] : vector<8x32xf32> to vector<8xf32>
      %78 = vector.shape_cast %77 : vector<8xf32> to vector<8x1xf32>
      %cst_50 = arith.constant 9.99999996E-13 : f32
      %79 = vector.broadcast %cst_50 : f32 to vector<8x1xf32>
      %80 = arith.maximumf %78, %79 : vector<8x1xf32>
      %81 = math.rsqrt %80 : vector<8x1xf32>
      %cst_51 = arith.constant dense<0.000000e+00> : vector<8x8xf32>
      %82 = tpu.matmul %75, %81, %cst_51 {dimension_numbers = #tpu.dot_dimension_numbers<[1], [1], [0], [0], [0, 0, 1, 0], [], []>} : vector<8x1xf32>, vector<8x1xf32>, vector<8x8xf32> -> vector<8x8xf32>
      %83 = arith.mulf %69, %82 : vector<8x8xf32>
      %c0_52 = arith.constant 0 : index
      %c0_53 = arith.constant 0 : index
      %84 = memref.load %arg5[%c0_52, %c0_53] : memref<1x1xf32, #tpu.memory_space<smem>>
      %85 = vector.broadcast %84 : f32 to vector<8x8xf32>
      %86 = arith.mulf %83, %85 : vector<8x8xf32>
      %c0_54 = arith.constant 0 : index
      %c0_55 = arith.constant 0 : index
      %87 = memref.load %arg6[%c0_54, %c0_55] : memref<1x1xf32, #tpu.memory_space<smem>>
      %88 = vector.broadcast %87 : f32 to vector<8x8xf32>
      %89 = arith.addf %86, %88 : vector<8x8xf32>
      %90 = tpu.iota {dimensions = array<i32: 0>} : vector<8x8xi32>
      %91 = tpu.iota {dimensions = array<i32: 1>} : vector<8x8xi32>
      %cst_56 = arith.constant dense<0xFF800000> : vector<8xf32>
      %92 = vector.multi_reduction <maximumf>, %89, %cst_56 [1] : vector<8x8xf32> to vector<8xf32>
      %93 = vector.shape_cast %92 : vector<8xf32> to vector<8x1xf32>
      %94 = vector.broadcast %93 : vector<8x1xf32> to vector<8x8xf32>
      %95 = arith.subf %89, %94 : vector<8x8xf32>
      %96 = math.exp %95 : vector<8x8xf32>
      %cst_57 = arith.constant dense<0.000000e+00> : vector<8xf32>
      %97 = vector.multi_reduction <add>, %96, %cst_57 [1] : vector<8x8xf32> to vector<8xf32>
      %98 = vector.shape_cast %97 : vector<8xf32> to vector<8x1xf32>
      %99 = math.log %98 : vector<8x1xf32>
      %100 = arith.addf %99, %93 : vector<8x1xf32>
      %101 = arith.cmpi eq, %90, %91 : vector<8x8xi32>
      %cst_58 = arith.constant 0.000000e+00 : f32
      %102 = vector.broadcast %cst_58 : f32 to vector<8x8xf32>
      %103 = arith.select %101, %89, %102 : vector<8x8xi1>, vector<8x8xf32>
      %cst_59 = arith.constant dense<0.000000e+00> : vector<8xf32>
      %104 = vector.multi_reduction <add>, %103, %cst_59 [1] : vector<8x8xf32> to vector<8xf32>
      %105 = vector.shape_cast %104 : vector<8xf32> to vector<8x1xf32>
      %106 = arith.subf %100, %105 : vector<8x1xf32>
      %cst_60 = arith.constant dense<0.000000e+00> : vector<1xf32>
      %107 = vector.multi_reduction <add>, %106, %cst_60 [0] : vector<8x1xf32> to vector<1xf32>
      %108 = vector.shape_cast %107 : vector<1xf32> to vector<1x1xf32>
      %cst_61 = arith.constant 1.250000e-01 : f32
      %109 = vector.broadcast %cst_61 : f32 to vector<1x1xf32>
      %110 = arith.mulf %108, %109 : vector<1x1xf32>
      %111 = arith.addf %56, %110 : vector<1x1xf32>
      %c0_62 = arith.constant 0 : index
      %c0_63 = arith.constant 0 : index
      %112 = vector.load %arg7[%c0_62, %c0_63] : memref<1x1xf32, #tpu.memory_space<vmem>>, vector<1x1xf32>
      tpu.vector_store %arg7[%c0_62, %c0_63], %111 {strides = array<i32>} : memref<1x1xf32, #tpu.memory_space<vmem>>, vector<1x1xf32>,
    } else {
    }
    return
  }
  func.func @transform_0(%arg0: i32) -> (i32, i32) {
    %c0_i32 = arith.constant 0 : i32
    %c0_i32_0 = arith.constant 0 : i32
    %c0_i32_1 = arith.constant 0 : i32
    return %c0_i32, %c0_i32_0 : i32, i32
  }
  func.func @transform_1(%arg0: i32) -> (i32, i32) {
    %c0_i32 = arith.constant 0 : i32
    %c0_i32_0 = arith.constant 0 : i32
    return %arg0, %c0_i32 : i32, i32
  }
  func.func @transform_2(%arg0: i32) -> (i32, i32) {
    %c0_i32 = arith.constant 0 : i32
    %c0_i32_0 = arith.constant 0 : i32
    return %c0_i32, %arg0 : i32, i32
  }
  func.func @transform_3(%arg0: i32) -> (i32, i32) {
    %c0_i32 = arith.constant 0 : i32
    %c0_i32_0 = arith.constant 0 : i32
    %c0_i32_1 = arith.constant 0 : i32
    return %c0_i32, %c0_i32_0 : i32, i32
  }
  func.func @transform_4(%arg0: i32) -> (i32, i32) {
    %c0_i32 = arith.constant 0 : i32
    %c0_i32_0 = arith.constant 0 : i32
    %c0_i32_1 = arith.constant 0 : i32
    return %c0_i32, %c0_i32_0 : i32, i32
  }
  func.func @transform_5(%arg0: i32) -> (i32, i32) {
    %c0_i32 = arith.constant 0 : i32
    %c0_i32_0 = arith.constant 0 : i32
    %c0_i32_1 = arith.constant 0 : i32
    return %c0_i32, %c0_i32_0 : i32, i32
  }
  func.func @transform_6(%arg0: i32) -> (i32, i32) {
    %c0_i32 = arith.constant 0 : i32
    %c0_i32_0 = arith.constant 0 : i32
    %c0_i32_1 = arith.constant 0 : i32
    return %c0_i32, %c0_i32_0 : i32, i32
  }
  func.func @transform_7(%arg0: i32) -> (i32, i32) {
    %c0_i32 = arith.constant 0 : i32
    %c0_i32_0 = arith.constant 0 : i32
    %c0_i32_1 = arith.constant 0 : i32
    return %c0_i32, %c0_i32_0 : i32, i32
  }
}

</mosaic_0001>

<bundles_post_ra>
// kernel: softmaxproto_loss.1
= control target key start
LH: loop header
LB: loop body
LE: loop exit
PB: predicated region body
PF: predicated region fallthrough
CT: control target
= control target key end

     0   :  { %15 = vsyncpa [#allocation8], 0  ;;  %vm50_vm0 = vcmask 261120   ;;  %s607_s0 = inlined_call_operand.vmem [shape: f32[16,32], index: 0, kind: input, shape index: {}]   ;;  %s608_s1 = inlined_call_operand.vmem [shape: f32[16,32], index: 1, kind: input, shape index: {}]   ;;  %s609_s2 = inlined_call_operand.vmem [shape: f32[1,16], index: 2, kind: input, shape index: {}]   ;;  %s610_s3 = inlined_call_operand.vmem [shape: s32[16,1], index: 3, kind: input, shape index: {}]   ;;  %s611_s4 = inlined_call_operand.<no memory space> [shape: f32[1,1], index: 4, kind: input, shape index: {}]   ;;  %s612_s5 = inlined_call_operand.<no memory space> [shape: f32[1,1], index: 5, kind: input, shape index: {}]   ;;  %s613_s6 = inlined_call_operand.hbm [shape: f32[1,1], index: 6, kind: output, shape index: {0}]   ;;  %s614_s7 = inlined_call_operand.hbm [shape: f32[1,1], index: 7, kind: output, shape index: {1}]  }
   0x1   :  { %v43_v0 = vld [vmem:[%s608_s1 + $0x8] sm:$0xff] }
   0x2   :  { %v41_v1 = vld [vmem:[%s607_s0 + $0x8] sm:$0xff]  ;;  %356 = vmatpush.xpose.msk.msra.mxu0 %vm50_vm0, %v43_v0  ;;  %366 = vmatpush.xpose.msk.msra.mxu3 %vm50_vm0, %v43_v0 }
   0x3   :  { %v246_v2 = vmul.f32 %v41_v1, %v41_v1 }
   0x4   :  { %16 = vsyncpa [#allocation10], 0  ;;  %v42_v3 = vld [vmem:[%s608_s1] sm:$0xff]  ;;  %362 = vmatpush.xpose.msk.msra.mxu1 %vm50_vm0, %v41_v1  ;;  %v449_v8 = vmov 0   ;;  %v87_v11 = vlaneseq  ;;  %vm106_vm2 = vcmask 130048   ;;  %vm33_vm4 = vcmask 7168  }
   0x5   :  { %v40_v4 = vld [vmem:[%s607_s0] sm:$0xff]  ;;  %v247_v5 = vsel %vm50_vm0, %v246_v2, 0.0  ;;  %374 = vset.pattern.permute.xlu1 %v449_v8  ;;  %373 = vset.pattern.permute.xlu2 %v449_v8  ;;  %v450_v39 = vmov -inf   ;;  %v451_v47 = vmov 0.0   ;;  %v45_v49 = vld [vmem:[%s610_s3 + $0x8] sm:$0xff]  ;;  %v289_v52 = vstv %s611_s4  ;;  %s342_s17 = sshll.u32 %s614_s7, 4  ;;  %s343_s17 = int_to_ptr.hbm [resolvable:$true] %s342_s17 }
   0x6   :  { %248 = vadd.xlane.f32.xlu0 %v247_v5  ;;  %357 = vmatpush.xpose.msk.msra.mxu0 %vm50_vm0, %v42_v3  ;;  %v231_v6 = vmul.f32 %v40_v4, %v40_v4  ;;  %v517_v16 = vand.u32 127, %v87_v11  ;;  %v376_v17 = vld [vmem:[%s609_s2] ss:$0 sm:$0xff]  ;;  %34 = vst.msk [vmem:[#allocation2] sm:$0xff] %vm33_vm4, %v450_v39  ;;  %v292_v54 = vstv %s612_s5  ;;  %vm296_vm10 = vcmask 64512   ;;  %s453_s7 = smov [#allocation7]  }
   0x7   :  { %367 = vmatpush.xpose.msk.msra.mxu3 %vm50_vm0, %v42_v3  ;;  %363 = vmatmul.msk.f32.vlgmr.msra.gmra.mxu1 %vm50_vm0, %v40_v4  ;;  %v44_v38 = vld [vmem:[%s610_s3] sm:$0xff]  ;;  %35 = vst.msk [vmem:[#allocation2 + $0x8] sm:$0xff] %vm33_vm4, %v450_v39  ;;  %s452_s3 = smov [#allocation9]   ;;  %s329_s18 = sshll.u32 %s453_s7, 4  ;;  %s330_s18 = int_to_ptr.vmem [resolvable:$true] %s329_s18 }
   0x8   :  { %v232_v7 = vsel %vm50_vm0, %v231_v6, 0.0  ;;  %375 = vset.pattern.permute.xlu0 %v449_v8  ;;  %vm91_vm1 = vcmp.lt.s32.totalorder %v517_v16, 16  ;;  %36 = vst.msk [vmem:[#allocation3] sm:$0xff] %vm33_vm4, %v451_v47  ;;  %s340_s4 = sshll.u32 %s452_s3, 4  ;;  %s331_s21 = sshll.u32 %s613_s6, 4  ;;  %s341_s4 = int_to_ptr.vmem [resolvable:$true] %s340_s4  ;;  %s332_s21 = int_to_ptr.hbm [resolvable:$true] %s331_s21 }
   0x9   :  { %358 = vmatmul.msk.f32.vlgmr.msra.gmra.mxu0 %vm50_vm0, %v40_v4  ;;  %37 = vst.msk [vmem:[#allocation3 + $0x8] sm:$0xff] %vm33_vm4, %v451_v47 }
   0xa   :  { %359 = vmatmul.msk.f32.vlgmr.msra.gmra.mxu3 %vm50_vm0, %v41_v1  ;;  %38 = vst.msk [vmem:[#allocation4] sm:$0xff] %vm33_vm4, %v451_v47  ;;  %vm209_vm0 = vcmask 0  }
   0xb   :  { %39 = vst.msk [vmem:[#allocation4 + $0x8] sm:$0xff] %vm33_vm4, %v451_v47 }
   0xd   :  { %v542_v40 = vld [vmem:[#allocation2] sm:$0xff] }
   0xe   :  { %233 = vadd.xlane.f32.xlu0 %v232_v7  ;;  %v119_v44 = vld [vmem:[#allocation2 + $0x8] sm:$0xff] }
  0x79   :  { %v249_v9 = vpop.xlane.xlu0 %248 }
  0x7a   :  { %v250_v10 = vmax.f32 %v249_v9, 1e-12  ;;  %v295_v9 = vshrl.u32 %v87_v11, 7 }
  0x7c   :  { %377 = vrsqrt.f32 %v250_v10  ;;  %vm257_vm5 = vweird.f32 %v250_v10  ;;  %vm309_vm13 = vcmp.eq.s32.totalorder %v295_v9, %v517_v16 }
  0x81   :  { %v234_v12 = vpop.xlane.xlu0 %233 }
  0x82   :  { %v378_v13 = vpop.eup %377  ;;  %v235_v14 = vmax.f32 %v234_v12, 1e-12 }
  0x83   :  { %v252_v15 = vmul.f32 %v378_v13, %v250_v10  ;;  %vm258_vm3 = vweird.f32 %v378_v13 }
  0x84   :  { %379 = vrsqrt.f32 %v235_v14  ;;  %vm259_vm6 = vmor %vm257_vm5, %vm258_vm3  ;;  %vm242_vm8 = vweird.f32 %v235_v14  ;;  %v228_v50 = vpop.f32.mrf.mxu1 }
  0x85   :  { %v253_v18 = vmul.f32 %v378_v13, %v252_v15 }
  0x86   :  { %v80_v19 = vpop.f32.mrf.mxu0 }
  0x87   :  { %v254_v20 = vmul.f32 0.5, %v253_v18  ;;  %v81_v21 = vadd.f32 %v376_v17, %v80_v19 }
  0x89   :  { %v255_v22 = vsub.f32 1.5, %v254_v20  ;;  %v525_v24 = vsel %vm91_vm1, %v81_v21, -inf }
  0x8a   :  { %v380_v23 = vpop.eup %379  ;;  %v120_v26 = vsel %vm106_vm2, %v525_v24, -inf }
  0x8b   :  { %v237_v25 = vmul.f32 %v380_v23, %v235_v14  ;;  %v256_v27 = vmul.f32 %v378_v13, %v255_v22  ;;  %121 = vmax.xlane.f32.xlu1 %v120_v26  ;;  %vm243_vm7 = vweird.f32 %v380_v23  ;;  %v128_v22 = vld [vmem:[#allocation3] sm:$0xff]  ;;  %v129_v26 = vld [vmem:[#allocation3 + $0x8] sm:$0xff] }
  0x8c   :  { %vm244_vm9 = vmor %vm242_vm8, %vm243_vm7 }
  0x8d   :  { %v238_v28 = vmul.f32 %v380_v23, %v237_v25  ;;  %v260_v29 = vsel %vm259_vm6, %v378_v13, %v256_v27  ;;  %v83_v30 = vpop.f32.mrf.mxu3  ;;  %v94_v27 = vld [vmem:[#allocation4] sm:$0xff] }
  0x8e   :  { %364 = vmatpush.xpose.msk.msra.mxu2 %vm33_vm4, %v260_v29  ;;  %v84_v31 = vadd.f32 %v376_v17, %v83_v30 }
  0x8f   :  { %v239_v32 = vmul.f32 0.5, %v238_v28 }
  0x90   :  { %v532_v33 = vsel %vm91_vm1, %v84_v31, -inf }
  0x91   :  { %v240_v34 = vsub.f32 1.5, %v239_v32  ;;  %v123_v35 = vsel %vm106_vm2, %v532_v33, -inf }
  0x93   :  { %v241_v36 = vmul.f32 %v380_v23, %v240_v34  ;;  %124 = vmax.xlane.f32.xlu1 %v123_v35 }
  0x95   :  { %v245_v37 = vsel %vm244_vm9, %v380_v23, %v241_v36 }
  0x96   :  { %365 = vmatmul.msk.f32.vlgmr.msra.gmra.mxu2 %vm33_vm4, %v245_v37 }
  0xac   :  { %97 = vperm.xlu1 %374, %v44_v38  }
  0xfe   :  { %v122_v41 = vpop.xlane.xlu1 %121 }
  0xff   :  { %v545_v42 = vmax.f32 %v542_v40, %v122_v41 }
 0x101   :  { %v130_v43 = vsub.f32 %v542_v40, %v545_v42  ;;  %164 = vst.msk [vmem:[#allocation2] sm:$0xff] %vm33_vm4, %v545_v42  ;;  %140 = vperm.xlu2 %373, %v545_v42  }
 0x103   :  { %v132_v11 = vmul.f32 1.442695, %v130_v43 }
 0x106   :  { %v125_v45 = vpop.xlane.xlu1 %124 }
 0x107   :  { %v127_v46 = vmax.f32 %v119_v44, %v125_v45 }
 0x108   :  { %v169_v37 = vld [vmem:[#allocation2] sm:$0xff] }
 0x109   :  { %v131_v48 = vsub.f32 %v119_v44, %v127_v46  ;;  %165 = vst.msk [vmem:[#allocation2 + $0x8] sm:$0xff] %vm33_vm4, %v127_v46  ;;  %145 = vperm.xlu2 %373, %v127_v46  }
 0x10b   :  { %v134_v20 = vmul.f32 1.442695, %v131_v48 }
 0x110   :  { %v170_v38 = vld [vmem:[#allocation2 + $0x8] sm:$0xff] }
 0x111   :  { %100 = vperm.xlu2 %373, %v45_v49  }
 0x119   :  { %v284_v51 = vpop.f32.mrf.mxu2 }
 0x11a   :  { %v287_v53 = vmul.f32 %v284_v51, %v228_v50 }
 0x11c   :  { %v290_v55 = vmul.f32 %v289_v52, %v287_v53 }
 0x11e   :  { %v293_v56 = vadd.f32 %v292_v54, %v290_v55  ;;  %v98_v0 = vpop.permute.xlu1 %97 }
 0x11f   :  { %vm102_vm11 = vcmp.eq.s32.totalorder %v517_v16, %v98_v0 }
 0x120   :  { %v297_v57 = vsel %vm296_vm10, %v293_v56, -inf  ;;  %v104_v3 = vsel %vm102_vm11, %v525_v24, 0.0  ;;  %v310_v12 = vsel %vm309_vm13, %v293_v56, 0.0 }
 0x121   :  { %298 = vmax.xlane.f32.xlu0 %v297_v57  ;;  %v107_v6 = vsel %vm106_vm2, %v104_v3, 0.0  ;;  %v311_v13 = vsel %vm296_vm10, %v310_v12, 0.0 }
 0x15b   :  { %v141_v58 = vpop.permute.xlu2 %140 }
 0x15c   :  { %v148_v59 = vsub.f32 %v525_v24, %v141_v58 }
 0x15e   :  { %v150_v60 = vmul.f32 1.442695, %v148_v59 }
 0x160   :  { %381 = vpow2.f32 %v150_v60 }
 0x163   :  { %v146_v61 = vpop.permute.xlu2 %145 }
 0x164   :  { %v149_v62 = vsub.f32 %v532_v33, %v146_v61 }
 0x166   :  { %v382_v63 = vpop.eup %381  ;;  %v152_v1 = vmul.f32 1.442695, %v149_v62 }
 0x167   :  { %v154_v2 = vsel %vm106_vm2, %v382_v63, 0.0 }
 0x168   :  { %383 = vpow2.f32 %v152_v1  ;;  %155 = vadd.xlane.f32.xlu0 %v154_v2 }
 0x16b   :  { %v101_v5 = vpop.permute.xlu2 %100 }
 0x16c   :  { %vm103_vm12 = vcmp.eq.s32.totalorder %v517_v16, %v101_v5 }
 0x16d   :  { %v105_v8 = vsel %vm103_vm12, %v532_v33, 0.0  ;;  %v95_v33 = vld [vmem:[#allocation4 + $0x8] sm:$0xff] }
 0x16e   :  { %v384_v4 = vpop.eup %383  ;;  %v110_v10 = vsel %vm106_vm2, %v105_v8, 0.0 }
 0x16f   :  { %v157_v7 = vsel %vm106_vm2, %v384_v4, 0.0 }
 0x170   :  { %108 = vadd.xlane.f32.xlu0 %v107_v6  ;;  %158 = vadd.xlane.f32.xlu2 %v157_v7 }
 0x178   :  { %111 = vadd.xlane.f32.xlu0 %v110_v10 }
 0x180   :  { %312 = vadd.xlane.f32.xlu0 %v311_v13 }
 0x194   :  { %v584_v14 = vpop.xlane.xlu0 %298 }
 0x195   :  { %v300_v15 = vsub.f32 %v293_v56, %v584_v14 }
 0x197   :  { %v301_v17 = vmul.f32 1.442695, %v300_v15 }
 0x199   :  { %385 = vpow2.f32 %v301_v17 }
 0x19a   :  { %387 = vpow2.f32 %v132_v11 }
 0x19b   :  { %389 = vpow2.f32 %v134_v20 }
 0x19f   :  { %v386_v18 = vpop.eup %385 }
 0x1a0   :  { %v303_v19 = vsel %vm296_vm10, %v386_v18, 0.0  ;;  %v388_v21 = vpop.eup %387 }
 0x1a1   :  { %304 = vadd.xlane.f32.xlu1 %v303_v19  ;;  %v136_v16 = vmul.f32 %v388_v21, %v128_v22  ;;  %v390_v25 = vpop.eup %389 }
 0x1a2   :  { %v137_v28 = vmul.f32 %v390_v25, %v129_v26 }
 0x1db   :  { %v156_v23 = vpop.xlane.xlu0 %155 }
 0x1dc   :  { %v160_v24 = vadd.f32 %v156_v23, %v136_v16 }
 0x1de   :  { %162 = vst.msk [vmem:[#allocation3] sm:$0xff] %vm33_vm4, %v160_v24 }
 0x1e3   :  { %v109_v29 = vpop.xlane.xlu0 %108  ;;  %v159_v30 = vpop.xlane.xlu2 %158 }
 0x1e4   :  { %v113_v31 = vadd.f32 %v109_v29, %v94_v27  ;;  %v161_v32 = vadd.f32 %v159_v30, %v137_v28 }
 0x1e5   :  { %v171_v43 = vld [vmem:[#allocation3] sm:$0xff] }
 0x1e6   :  { %116 = vst.msk [vmem:[#allocation4] sm:$0xff] %vm33_vm4, %v113_v31 }
 0x1e7   :  { %163 = vst.msk [vmem:[#allocation3 + $0x8] sm:$0xff] %vm33_vm4, %v161_v32 }
 0x1eb   :  { %v112_v34 = vpop.xlane.xlu0 %111 }
 0x1ec   :  { %v114_v35 = vadd.f32 %v112_v34, %v95_v33 }
 0x1ed   :  { %v179_v36 = vld [vmem:[#allocation4] sm:$0xff] }
 0x1ee   :  { %117 = vst.msk [vmem:[#allocation4 + $0x8] sm:$0xff] %vm33_vm4, %v114_v35  ;;  %vm193_vm14 = vcmp.ge.f32.partialorder %v179_v36, %v169_v37  ;;  %v172_v41 = vld [vmem:[#allocation3 + $0x8] sm:$0xff] }
 0x1ef   :  { %v360_v40 = vsel %vm193_vm14, 1.0, %v451_v47  ;;  %391 = vlog2.f32 %v172_v41 }
 0x1f0   :  { %v199_v44 = vsel %vm33_vm4, %v360_v40, 0.0  ;;  %393 = vlog2.f32 %v171_v43 }
 0x1f3   :  { %v313_v8 = vpop.xlane.xlu0 %312 }
 0x1f5   :  { %v180_v39 = vld [vmem:[#allocation4 + $0x8] sm:$0xff]  ;;  %v392_v50 = vpop.eup %391 }
 0x1f6   :  { %vm194_vm15 = vcmp.ge.f32.partialorder %v180_v39, %v170_v38  ;;  %v394_v52 = vpop.eup %393  ;;  %v176_v54 = vmul.f32 0.6931472, %v392_v50 }
 0x1f7   :  { %v361_v42 = vsel %vm194_vm15, 1.0, %v451_v47  ;;  %v174_v56 = vmul.f32 0.6931472, %v394_v52 }
 0x1f8   :  { %v200_v45 = vsel %vm33_vm4, %v361_v42, 0.0  ;;  %v178_v57 = vadd.f32 %v176_v54, %v170_v38 }
 0x1f9   :  { %v201_v46 = vadd.f32 %v200_v45, %v199_v44  ;;  %v177_v59 = vadd.f32 %v174_v56, %v169_v37 }
 0x1fa   :  { %v182_v60 = vsub.f32 %v178_v57, %v180_v39 }
 0x1fb   :  { %v202_v48 = vrot.slane %v201_v46, 4  ;;  %v181_v61 = vsub.f32 %v177_v59, %v179_v36 }
 0x1fc   :  { %v184_v62 = vsel %vm33_vm4, %v182_v60, 0.0 }
 0x1fd   :  { %v203_v49 = vadd.f32 %v202_v48, %v201_v46  ;;  %v183_v63 = vsel %vm33_vm4, %v181_v61, 0.0 }
 0x1fe   :  { %v185_v0 = vadd.f32 %v184_v62, %v183_v63 }
 0x1ff   :  { %v204_v51 = vrot.slane %v203_v49, 2 }
 0x200   :  { %v186_v2 = vrot.slane %v185_v0, 4 }
 0x201   :  { %v205_v53 = vadd.f32 %v204_v51, %v203_v49 }
 0x202   :  { %v187_v3 = vadd.f32 %v186_v2, %v185_v0 }
 0x203   :  { %v206_v55 = vrot.slane %v205_v53, 1 }
 0x204   :  { %v188_v7 = vrot.slane %v187_v3, 2 }
 0x205   :  { %v207_v47 = vadd.f32 %v206_v55, %v205_v53 }
 0x206   :  { %v189_v12 = vadd.f32 %v188_v7, %v187_v3 }
 0x207   :  { %v208_v58 = vmul.f32 6.25, %v207_v47 }
 0x208   :  { %v190_v17 = vrot.slane %v189_v12, 1 }
 0x209   :  { %210 = vst.msk [vmem:[#allocation9] sm:$0x1] %vm209_vm0, %v208_v58 }
 0x20a   :  { %345 = dma.vmem_to_hbm [thread:$0]  %s341_s4, 16, %s343_s17, [#allocation10]   ;;  %v191_v19 = vadd.f32 %v190_v17, %v189_v12 }
 0x20c   :  { %v192_v21 = vmul.f32 0.0625, %v191_v19 }
 0x214   :  { %v305_v1 = vpop.xlane.xlu1 %304 }
 0x215   :  { %395 = vlog2.f32 %v305_v1 }
 0x21b   :  { %v396_v4 = vpop.eup %395 }
 0x21c   :  { %v307_v5 = vmul.f32 0.6931472, %v396_v4 }
 0x21e   :  { %v308_v6 = vadd.f32 %v307_v5, %v584_v14 }
 0x220   :  { %v314_v9 = vsub.f32 %v308_v6, %v313_v8 }
 0x222   :  { %v315_v10 = vrot.slane %v314_v9, 4 }
 0x224   :  { %v316_v13 = vadd.f32 %v315_v10, %v314_v9 }
 0x226   :  { %v317_v15 = vrot.slane %v316_v13, 2 }
 0x228   :  { %v318_v18 = vadd.f32 %v317_v15, %v316_v13 }
 0x22a   :  { %v319_v11 = vrot.slane %v318_v18, 1 }
 0x22c   :  { %v320_v20 = vadd.f32 %v319_v11, %v318_v18 }
 0x22e   :  { %v321_v14 = vmul.f32 0.125, %v320_v20 }
 0x230   :  { %v322_v22 = vadd.f32 %v321_v14, %v192_v21 }
 0x232   :  { %323 = vst.msk [vmem:[#allocation7] sm:$0x1] %vm209_vm0, %v322_v22 }
 0x233   :  { %334 = dma.vmem_to_hbm [thread:$0]  %s330_s18, 16, %s332_s21, [#allocation8]  }
 0x234   :  { %445 = dma.done.wait [#allocation8], 16  }
 0x235   :  { %446 = vsyncadd [#allocation8], 4294967280 }
 0x236   :  { %447 = dma.done.wait [#allocation10], 16  }
 0x237   :  { %448 = vsyncadd [#allocation10], 4294967280 }
 0x238   :  { %354 = vsyncpa [#allocation8], 1 }
 0x239   :  { %355 = vsyncpa [#allocation10], 1 }

</bundles_post_ra>
